<compile_context>
chip_gen: v7x
topology: tpu7x:2x2x1
jax: 0.10.0
libtpu: 0.0.40
codegen_flags: <defaults>
</compile_context>

<pallas_src>
import functools

import jax
import jax.numpy as jnp
from jax.experimental import pallas as pl
from jax.experimental.pallas import tpu as pltpu


def vae_kernel(x_ref, eps_ref,
               w1_ref, b1_ref,
               wml_ref, bml_ref,     # fused [w_mu | w_logvar], [b_mu | b_logvar]
               w2_ref, b2_ref,
               w3_ref, b3_ref,
               recon_ref, mulv_ref):
    latent = eps_ref.shape[-1]

    x = x_ref[...]

    # ---- encode ----
    h = jnp.dot(x, w1_ref[...], preferred_element_type=jnp.float32) + b1_ref[...]
    h = jnp.maximum(h, 0.0)  # relu

    # fused mu|logvar head: one (TB, hidden) @ (hidden, 2*latent) matmul
    mulv = jnp.dot(h, wml_ref[...], preferred_element_type=jnp.float32) + bml_ref[...]
    mu = mulv[:, :latent]
    logvar = mulv[:, latent:]

    # ---- reparameterize ----
    std = jnp.exp(0.5 * logvar)
    z = mu + eps_ref[...] * std

    # ---- decode ----
    h2 = jnp.dot(z, w2_ref[...], preferred_element_type=jnp.float32) + b2_ref[...]
    h2 = jnp.maximum(h2, 0.0)  # relu
    recon = jnp.dot(h2, w3_ref[...], preferred_element_type=jnp.float32) + b3_ref[...]

    recon_ref[...] = recon.astype(recon_ref.dtype)
    mulv_ref[...] = mulv.astype(mulv_ref.dtype)


def make_vae_params(key, input_dim, latent_dim, hidden=64, dtype=jnp.float32):
    """Deterministic synthetic init (PyTorch-Linear-style uniform ranges).
    Weights are returned already transposed to (in, out); biases as (1, out)."""
    def linear(k, fan_in, fan_out):
        kw, kb = jax.random.split(k)
        bound = 1.0 / jnp.sqrt(float(fan_in))
        w = jax.random.uniform(kw, (fan_in, fan_out), dtype, -bound, bound)
        b = jax.random.uniform(kb, (1, fan_out), dtype, -bound, bound)
        return w, b

    k1, k2, k3, k4, k5 = jax.random.split(key, 5)
    params = {}
    params["w1"], params["b1"] = linear(k1, input_dim, hidden)     # fc1
    params["wmu"], params["bmu"] = linear(k2, hidden, latent_dim)  # fc_mu
    params["wlv"], params["blv"] = linear(k3, hidden, latent_dim)  # fc_logvar
    params["w2"], params["b2"] = linear(k4, latent_dim, hidden)    # fc2
    params["w3"], params["b3"] = linear(k5, hidden, input_dim)     # fc3
    return params


@functools.partial(jax.jit, static_argnames=("block_b",))
def vae_forward(x, eps, params, *, block_b=256):
    B, input_dim = x.shape
    latent_dim = eps.shape[1]
    hidden = params["w1"].shape[1]

    # Pack the mu/logvar head into one weight/bias (wrapper-side layout plumbing).
    wml = jnp.concatenate([params["wmu"], params["wlv"]], axis=1)  # (hidden, 2*latent)
    bml = jnp.concatenate([params["bmu"], params["blv"]], axis=1)  # (1, 2*latent)

    # Batch tile: multiple of 8 (f32 sublane); sized so double-buffered activation
    # blocks + resident weights stay well under v7x's 64 MiB VMEM.
    tb = min(block_b, max(8, B))
    tb = max(8, (tb // 8) * 8)
    pad = (-B) % tb
    if pad:
        x = jnp.pad(x, ((0, pad), (0, 0)))
        eps = jnp.pad(eps, ((0, pad), (0, 0)))
    Bp = B + pad
    grid = (Bp // tb,)

    def act_spec(feat):
        return pl.BlockSpec((tb, feat), lambda i: (i, 0))

    def weight_spec(shape):
        # weights/biases stay resident across the batch grid
        return pl.BlockSpec(shape, lambda i: (0, 0))

    out_shapes = (
        jax.ShapeDtypeStruct((Bp, input_dim), x.dtype),       # x_recon
        jax.ShapeDtypeStruct((Bp, 2 * latent_dim), x.dtype),  # [mu | logvar]
    )

    recon, mulv = pl.pallas_call(
        vae_kernel,
        out_shape=out_shapes,
        grid=grid,
        in_specs=[
            act_spec(input_dim),                      # x
            act_spec(latent_dim),                     # eps
            weight_spec((input_dim, hidden)),  weight_spec((1, hidden)),          # fc1
            weight_spec((hidden, 2 * latent_dim)), weight_spec((1, 2 * latent_dim)),  # fused head
            weight_spec((latent_dim, hidden)), weight_spec((1, hidden)),          # fc2
            weight_spec((hidden, input_dim)),  weight_spec((1, input_dim)),       # fc3
        ],
        out_specs=(
            pl.BlockSpec((tb, input_dim), lambda i: (i, 0)),
            pl.BlockSpec((tb, 2 * latent_dim), lambda i: (i, 0)),
        ),
        compiler_params=pltpu.CompilerParams(
            dimension_semantics=("parallel",),
        ),
    )(x, eps,
      params["w1"], params["b1"],
      wml, bml,
      params["w2"], params["b2"],
      params["w3"], params["b3"])

    recon = recon[:B]
    mu = mulv[:B, :latent_dim]
    logvar = mulv[:B, latent_dim:]
    return recon, mu, logvar


def vae_forward_ref(x, eps, params):
    """Plain-JAX reference mirroring the PyTorch forward."""
    h = jnp.maximum(x @ params["w1"] + params["b1"], 0.0)
    mu = h @ params["wmu"] + params["bmu"]
    logvar = h @ params["wlv"] + params["blv"]
    z = mu + eps * jnp.exp(0.5 * logvar)
    h2 = jnp.maximum(z @ params["w2"] + params["b2"], 0.0)
    recon = h2 @ params["w3"] + params["b3"]
    return recon, mu, logvar


if __name__ == "__main__":
    key = jax.random.PRNGKey(0)
    k_x, k_eps, k_p = jax.random.split(key, 3)

    batch = 8
    input_dim = 32
    latent_dim = 16

    x = jax.random.normal(k_x, (batch, input_dim), jnp.float32)
    eps = jax.random.normal(k_eps, (batch, latent_dim), jnp.float32)
    params = make_vae_params(k_p, input_dim, latent_dim)

    recon, mu, logvar = vae_forward(x, eps, params)
    jax.block_until_ready((recon, mu, logvar))

    r_ref, mu_ref, lv_ref = vae_forward_ref(x, eps, params)
    assert jnp.allclose(recon, r_ref, atol=1e-5, rtol=1e-5)
    assert jnp.allclose(mu, mu_ref, atol=1e-5, rtol=1e-5)
    assert jnp.allclose(logvar, lv_ref, atol=1e-5, rtol=1e-5)

    print("KERNEL_OK")
</pallas_src>

<mosaic_0001>
module attributes {stable_mosaic.version = 11 : i64} {
  func.func @vae_kernel(%arg0: i32, %arg1: memref<8x32xf32, #tpu.memory_space<vmem>>, %arg2: memref<8x16xf32, #tpu.memory_space<vmem>>, %arg3: memref<32x64xf32, #tpu.memory_space<vmem>>, %arg4: memref<1x64xf32, #tpu.memory_space<vmem>>, %arg5: memref<64x32xf32, #tpu.memory_space<vmem>>, %arg6: memref<1x32xf32, #tpu.memory_space<vmem>>, %arg7: memref<16x64xf32, #tpu.memory_space<vmem>>, %arg8: memref<1x64xf32, #tpu.memory_space<vmem>>, %arg9: memref<64x32xf32, #tpu.memory_space<vmem>>, %arg10: memref<1x32xf32, #tpu.memory_space<vmem>>, %arg11: memref<8x32xf32, #tpu.memory_space<vmem>>, %arg12: memref<8x32xf32, #tpu.memory_space<vmem>>) attributes {dimension_semantics = [#tpu.dimension_semantics<parallel>], iteration_bounds = array<i64: 1>, scalar_prefetch = 0 : i64, scratch_operands = 0 : i64, tpu.core_type = #tpu.core_type<tc>, window_params = [{transform_indices = @transform_0, window_bounds = array<i64: 8, 32>}, {transform_indices = @transform_1, window_bounds = array<i64: 8, 16>}, {pipeline_mode = #tpu.pipeline_mode<synchronous>, transform_indices = @transform_2, window_bounds = array<i64: 32, 64>}, {pipeline_mode = #tpu.pipeline_mode<synchronous>, transform_indices = @transform_3, window_bounds = array<i64: 1, 64>}, {pipeline_mode = #tpu.pipeline_mode<synchronous>, transform_indices = @transform_4, window_bounds = array<i64: 64, 32>}, {pipeline_mode = #tpu.pipeline_mode<synchronous>, transform_indices = @transform_5, window_bounds = array<i64: 1, 32>}, {pipeline_mode = #tpu.pipeline_mode<synchronous>, transform_indices = @transform_6, window_bounds = array<i64: 16, 64>}, {pipeline_mode = #tpu.pipeline_mode<synchronous>, transform_indices = @transform_7, window_bounds = array<i64: 1, 64>}, {pipeline_mode = #tpu.pipeline_mode<synchronous>, transform_indices = @transform_8, window_bounds = array<i64: 64, 32>}, {pipeline_mode = #tpu.pipeline_mode<synchronous>, transform_indices = @transform_9, window_bounds = array<i64: 1, 32>}, {transform_indices = @transform_10, window_bounds = array<i64: 8, 32>}, {transform_indices = @transform_11, window_bounds = array<i64: 8, 32>}]} {
    %c0 = arith.constant 0 : index
    %c0_0 = arith.constant 0 : index
    %0 = vector.load %arg1[%c0, %c0_0] : memref<8x32xf32, #tpu.memory_space<vmem>>, vector<8x32xf32>
    %c0_1 = arith.constant 0 : index
    %c0_2 = arith.constant 0 : index
    %1 = vector.load %arg3[%c0_1, %c0_2] : memref<32x64xf32, #tpu.memory_space<vmem>>, vector<32x64xf32>
    %cst = arith.constant dense<0.000000e+00> : vector<8x64xf32>
    %2 = tpu.matmul %0, %1, %cst {dimension_numbers = #tpu.dot_dimension_numbers<[1], [0], [0], [1], [0, 0, 1, 1], [], []>} : vector<8x32xf32>, vector<32x64xf32>, vector<8x64xf32> -> vector<8x64xf32>
    %c0_3 = arith.constant 0 : index
    %c0_4 = arith.constant 0 : index
    %3 = vector.load %arg4[%c0_3, %c0_4] : memref<1x64xf32, #tpu.memory_space<vmem>>, vector<1x64xf32>
    %4 = vector.broadcast %3 : vector<1x64xf32> to vector<8x64xf32>
    %5 = arith.addf %2, %4 : vector<8x64xf32>
    %cst_5 = arith.constant 0.000000e+00 : f32
    %6 = vector.broadcast %cst_5 : f32 to vector<8x64xf32>
    %7 = arith.maximumf %5, %6 : vector<8x64xf32>
    %c0_6 = arith.constant 0 : index
    %c0_7 = arith.constant 0 : index
    %8 = vector.load %arg5[%c0_6, %c0_7] : memref<64x32xf32, #tpu.memory_space<vmem>>, vector<64x32xf32>
    %cst_8 = arith.constant dense<0.000000e+00> : vector<8x32xf32>
    %9 = tpu.matmul %7, %8, %cst_8 {dimension_numbers = #tpu.dot_dimension_numbers<[1], [0], [0], [1], [0, 0, 1, 1], [], []>} : vector<8x64xf32>, vector<64x32xf32>, vector<8x32xf32> -> vector<8x32xf32>
    %c0_9 = arith.constant 0 : index
    %c0_10 = arith.constant 0 : index
    %10 = vector.load %arg6[%c0_9, %c0_10] : memref<1x32xf32, #tpu.memory_space<vmem>>, vector<1x32xf32>
    %11 = vector.broadcast %10 : vector<1x32xf32> to vector<8x32xf32>
    %12 = arith.addf %9, %11 : vector<8x32xf32>
    %13 = vector.extract_strided_slice %12 {offsets = [0, 0], sizes = [8, 16], strides = [1, 1]} : vector<8x32xf32> to vector<8x16xf32>
    %14 = vector.extract_strided_slice %12 {offsets = [0, 16], sizes = [8, 16], strides = [1, 1]} : vector<8x32xf32> to vector<8x16xf32>
    %cst_11 = arith.constant 5.000000e-01 : f32
    %15 = vector.broadcast %cst_11 : f32 to vector<8x16xf32>
    %16 = arith.mulf %15, %14 : vector<8x16xf32>
    %17 = math.exp %16 : vector<8x16xf32>
    %c0_12 = arith.constant 0 : index
    %c0_13 = arith.constant 0 : index
    %18 = vector.load %arg2[%c0_12, %c0_13] : memref<8x16xf32, #tpu.memory_space<vmem>>, vector<8x16xf32>
    %19 = arith.mulf %18, %17 : vector<8x16xf32>
    %20 = arith.addf %13, %19 : vector<8x16xf32>
    %c0_14 = arith.constant 0 : index
    %c0_15 = arith.constant 0 : index
    %21 = vector.load %arg7[%c0_14, %c0_15] : memref<16x64xf32, #tpu.memory_space<vmem>>, vector<16x64xf32>
    %cst_16 = arith.constant dense<0.000000e+00> : vector<8x64xf32>
    %22 = tpu.matmul %20, %21, %cst_16 {dimension_numbers = #tpu.dot_dimension_numbers<[1], [0], [0], [1], [0, 0, 1, 1], [], []>} : vector<8x16xf32>, vector<16x64xf32>, vector<8x64xf32> -> vector<8x64xf32>
    %c0_17 = arith.constant 0 : index
    %c0_18 = arith.constant 0 : index
    %23 = vector.load %arg8[%c0_17, %c0_18] : memref<1x64xf32, #tpu.memory_space<vmem>>, vector<1x64xf32>
    %24 = vector.broadcast %23 : vector<1x64xf32> to vector<8x64xf32>
    %25 = arith.addf %22, %24 : vector<8x64xf32>
    %cst_19 = arith.constant 0.000000e+00 : f32
    %26 = vector.broadcast %cst_19 : f32 to vector<8x64xf32>
    %27 = arith.maximumf %25, %26 : vector<8x64xf32>
    %c0_20 = arith.constant 0 : index
    %c0_21 = arith.constant 0 : index
    %28 = vector.load %arg9[%c0_20, %c0_21] : memref<64x32xf32, #tpu.memory_space<vmem>>, vector<64x32xf32>
    %cst_22 = arith.constant dense<0.000000e+00> : vector<8x32xf32>
    %29 = tpu.matmul %27, %28, %cst_22 {dimension_numbers = #tpu.dot_dimension_numbers<[1], [0], [0], [1], [0, 0, 1, 1], [], []>} : vector<8x64xf32>, vector<64x32xf32>, vector<8x32xf32> -> vector<8x32xf32>
    %c0_23 = arith.constant 0 : index
    %c0_24 = arith.constant 0 : index
    %30 = vector.load %arg10[%c0_23, %c0_24] : memref<1x32xf32, #tpu.memory_space<vmem>>, vector<1x32xf32>
    %31 = vector.broadcast %30 : vector<1x32xf32> to vector<8x32xf32>
    %32 = arith.addf %29, %31 : vector<8x32xf32>
    %c0_25 = arith.constant 0 : index
    %c0_26 = arith.constant 0 : index
    %33 = vector.load %arg11[%c0_25, %c0_26] : memref<8x32xf32, #tpu.memory_space<vmem>>, vector<8x32xf32>
    tpu.vector_store %arg11[%c0_25, %c0_26], %32 {strides = array<i32>} : memref<8x32xf32, #tpu.memory_space<vmem>>, vector<8x32xf32>,
    %c0_27 = arith.constant 0 : index
    %c0_28 = arith.constant 0 : index
    %34 = vector.load %arg12[%c0_27, %c0_28] : memref<8x32xf32, #tpu.memory_space<vmem>>, vector<8x32xf32>
    tpu.vector_store %arg12[%c0_27, %c0_28], %12 {strides = array<i32>} : memref<8x32xf32, #tpu.memory_space<vmem>>, vector<8x32xf32>,
    return
  }
  func.func @transform_0(%arg0: i32) -> (i32, i32) {
    %c0_i32 = arith.constant 0 : i32
    %c0_i32_0 = arith.constant 0 : i32
    return %arg0, %c0_i32 : i32, i32
  }
  func.func @transform_1(%arg0: i32) -> (i32, i32) {
    %c0_i32 = arith.constant 0 : i32
    %c0_i32_0 = arith.constant 0 : i32
    return %arg0, %c0_i32 : i32, i32
  }
  func.func @transform_2(%arg0: i32) -> (i32, i32) {
    %c0_i32 = arith.constant 0 : i32
    %c0_i32_0 = arith.constant 0 : i32
    %c0_i32_1 = arith.constant 0 : i32
    return %c0_i32, %c0_i32_0 : i32, i32
  }
  func.func @transform_3(%arg0: i32) -> (i32, i32) {
    %c0_i32 = arith.constant 0 : i32
    %c0_i32_0 = arith.constant 0 : i32
    %c0_i32_1 = arith.constant 0 : i32
    return %c0_i32, %c0_i32_0 : i32, i32
  }
  func.func @transform_4(%arg0: i32) -> (i32, i32) {
    %c0_i32 = arith.constant 0 : i32
    %c0_i32_0 = arith.constant 0 : i32
    %c0_i32_1 = arith.constant 0 : i32
    return %c0_i32, %c0_i32_0 : i32, i32
  }
  func.func @transform_5(%arg0: i32) -> (i32, i32) {
    %c0_i32 = arith.constant 0 : i32
    %c0_i32_0 = arith.constant 0 : i32
    %c0_i32_1 = arith.constant 0 : i32
    return %c0_i32, %c0_i32_0 : i32, i32
  }
  func.func @transform_6(%arg0: i32) -> (i32, i32) {
    %c0_i32 = arith.constant 0 : i32
    %c0_i32_0 = arith.constant 0 : i32
    %c0_i32_1 = arith.constant 0 : i32
    return %c0_i32, %c0_i32_0 : i32, i32
  }
  func.func @transform_7(%arg0: i32) -> (i32, i32) {
    %c0_i32 = arith.constant 0 : i32
    %c0_i32_0 = arith.constant 0 : i32
    %c0_i32_1 = arith.constant 0 : i32
    return %c0_i32, %c0_i32_0 : i32, i32
  }
  func.func @transform_8(%arg0: i32) -> (i32, i32) {
    %c0_i32 = arith.constant 0 : i32
    %c0_i32_0 = arith.constant 0 : i32
    %c0_i32_1 = arith.constant 0 : i32
    return %c0_i32, %c0_i32_0 : i32, i32
  }
  func.func @transform_9(%arg0: i32) -> (i32, i32) {
    %c0_i32 = arith.constant 0 : i32
    %c0_i32_0 = arith.constant 0 : i32
    %c0_i32_1 = arith.constant 0 : i32
    return %c0_i32, %c0_i32_0 : i32, i32
  }
  func.func @transform_10(%arg0: i32) -> (i32, i32) {
    %c0_i32 = arith.constant 0 : i32
    %c0_i32_0 = arith.constant 0 : i32
    return %arg0, %c0_i32 : i32, i32
  }
  func.func @transform_11(%arg0: i32) -> (i32, i32) {
    %c0_i32 = arith.constant 0 : i32
    %c0_i32_0 = arith.constant 0 : i32
    return %arg0, %c0_i32 : i32, i32
  }
}

</mosaic_0001>

<bundles_post_ra>
// kernel: vae_forward.1
= control target key start
LH: loop header
LB: loop body
LE: loop exit
PB: predicated region body
PF: predicated region fallthrough
CT: control target
= control target key end

     0   :  { %v570_v3 = vmov 0.0|0.0   ;;  %vm571_vm0 = vmmov 0   ;;  %v572_v6 = vmov 0.0   ;;  %s758_s0 = inlined_call_operand.vmem [shape: f32[8,32], index: 0, kind: input, shape index: {}]   ;;  %s759_s1 = inlined_call_operand.vmem [shape: f32[8,16], index: 1, kind: input, shape index: {}]   ;;  %s760_s2 = inlined_call_operand.vmem [shape: f32[32,64], index: 2, kind: input, shape index: {}]   ;;  %s761_s3 = inlined_call_operand.vmem [shape: f32[1,64], index: 3, kind: input, shape index: {}]   ;;  %s762_s4 = inlined_call_operand.vmem [shape: f32[64,32], index: 4, kind: input, shape index: {}]   ;;  %s763_s5 = inlined_call_operand.vmem [shape: f32[1,32], index: 5, kind: input, shape index: {}]   ;;  %s764_s6 = inlined_call_operand.vmem [shape: f32[16,64], index: 6, kind: input, shape index: {}]   ;;  %s765_s7 = inlined_call_operand.vmem [shape: f32[1,64], index: 7, kind: input, shape index: {}]   ;;  %s766_s8 = inlined_call_operand.vmem [shape: f32[64,32], index: 8, kind: input, shape index: {}]   ;;  %s767_s9 = inlined_call_operand.vmem [shape: f32[1,32], index: 9, kind: input, shape index: {}]   ;;  %s768_s10 = inlined_call_operand.hbm [shape: f32[8,32], index: 10, kind: output, shape index: {0}]   ;;  %s769_s11 = inlined_call_operand.vmem [shape: f32[8,32], index: 11, kind: output, shape index: {1}]  }
   0x1   :  { %v39_v0 = vld [vmem:[%s760_s2] sm:$0xff]  ;;  %v40_v1 = vld [vmem:[%s760_s2 + $0x8] sm:$0xff]  ;;  %v41_v2 = vld [vmem:[%s760_s2 + $0x10] sm:$0xff]  ;;  %506 = vmatprep.subr.bf16.mxu1 %v570_v3  ;;  %458 = vmatprep.mubr.msk.f32.mxu1 %vm571_vm0, %v572_v6 }
   0x2   :  { %v507_v4 = vpack.c.bf16 %v40_v1, %v39_v0  ;;  %v42_v5 = vld [vmem:[%s760_s2 + $0x18] sm:$0xff]  ;;  %524 = vmatprep.subr.bf16.mxu0 %v570_v3  ;;  %484 = vmatprep.mubr.msk.f32.mxu0 %vm571_vm0, %v572_v6  ;;  %v125_v8 = vld [vmem:[%s762_s4] sm:$0xff]  ;;  %v126_v9 = vld [vmem:[%s762_s4 + $0x8] sm:$0xff] }
   0x3   :  { %v510_v7 = vpack.c.bf16 %v42_v5, %v41_v2 }
   0x4   :  { %508 = vmatpush3.bf16.msra.mxu1 %v507_v4 }
   0x5   :  { %509 = vmatprep.subr.bf16.mxu1 %v570_v3 }
   0x6   :  { %17 = vsyncpa [#allocation3], 0  ;;  %v38_v10 = vld [vmem:[%s758_s0] sm:$0xff]  ;;  %vm50_vm1 = vcmask 261120   ;;  %v513_v11 = vpack.c.bf16 %v126_v9, %v125_v8  ;;  %v127_v12 = vld [vmem:[%s762_s4 + $0x10] sm:$0xff]  ;;  %vm140_vm2 = vcmask 523264  }
   0x7   :  { %v128_v13 = vld [vmem:[%s762_s4 + $0x18] sm:$0xff]  ;;  %v129_v15 = vld [vmem:[%s762_s4 + $0x20] sm:$0xff]  ;;  %v130_v16 = vld [vmem:[%s762_s4 + $0x28] sm:$0xff]  ;;  %vm233_vm3 = vcmask 130048  }
   0x8   :  { %511 = vmatpush3.bf16.msra.mxu1 %v510_v7  ;;  %v516_v14 = vpack.c.bf16 %v128_v13, %v127_v12  ;;  %v519_v17 = vpack.c.bf16 %v130_v16, %v129_v15  ;;  %v131_v18 = vld [vmem:[%s762_s4 + $0x30] sm:$0xff]  ;;  %v132_v19 = vld [vmem:[%s762_s4 + $0x38] sm:$0xff]  ;;  %v416_v21 = vld [vmem:[%s761_s3] ss:$0 sm:$0xff]  ;;  %s574_s3 = smov [#allocation2]  }
   0x9   :  { %512 = vmatprep.subr.bf16.mxu1 %v570_v3  ;;  %v522_v20 = vpack.c.bf16 %v132_v19, %v131_v18  ;;  %v418_v26 = vld [vmem:[%s763_s5] ss:$0 sm:$0xff]  ;;  %v225_v32 = vld [vmem:[%s764_s6 + $0x8] sm:$0xff]  ;;  %s573_s5 = smov 112   ;;  %v310_v43 = vld [vmem:[%s766_s8 + $0x10] sm:$0xff]  ;;  %s404_s27 = sshll.u32 %s574_s3, 4  ;;  %s405_s27 = int_to_ptr.vmem [resolvable:$true] %s404_s27 }
   0xa   :  { %v224_v31 = vld [vmem:[%s764_s6] sm:$0xff]  ;;  %v309_v38 = vld [vmem:[%s766_s8 + $0x8] sm:$0xff]  ;;  %v311_v44 = vld [vmem:[%s766_s8 + $0x18] sm:$0xff]  ;;  %p551_p1 = scmp.lt.s32.totalorder %s405_s27, %s405_s27 }
   0xb   :  { %459 = vmatmul.mubr.msk.f32.vlgmr.msra.gmra.mrb[0].mxu1 %vm50_vm1, %v38_v10  ;;  %v525_v33 = vpack.c.bf16 %v225_v32, %v224_v31  ;;  %v217_v36 = vld [vmem:[%s759_s1] sm:$0xff]  ;;  %v531_v45 = vpack.c.bf16 %v311_v44, %v310_v43  ;;  %v313_v47 = vld [vmem:[%s766_s8 + $0x28] sm:$0xff]  ;;  %v314_v49 = vld [vmem:[%s766_s8 + $0x30] sm:$0xff] }
   0xc   :  { %514 = vmatpush3.bf16.msra.mxu1 %v513_v11  ;;  %477 = vmatprep.mubr.msk.f32.mxu1 %vm571_vm0, %v572_v6  ;;  %v308_v37 = vld [vmem:[%s766_s8] sm:$0xff]  ;;  %v315_v50 = vld [vmem:[%s766_s8 + $0x38] sm:$0xff] }
   0xd   :  { %515 = vmatprep.subr.bf16.mxu1 %v570_v3  ;;  %526 = vmatpush3.bf16.msra.mxu0 %v525_v33  ;;  %v528_v41 = vpack.c.bf16 %v309_v38, %v308_v37  ;;  %v312_v46 = vld [vmem:[%s766_s8 + $0x20] sm:$0xff]  ;;  %v537_v51 = vpack.c.bf16 %v315_v50, %v314_v49  ;;  %s546_s8 = scalar_lea.vmem %s405_s27, 128 }
   0xe   :  { %527 = vmatprep.subr.bf16.mxu0 %v570_v3  ;;  %v534_v48 = vpack.c.bf16 %v313_v47, %v312_v46  ;;  %v420_v52 = vld [vmem:[%s765_s7] ss:$0 sm:$0xff]  ;;  %p547_p0 = scmp.ne.s32.totalorder %s405_s27, %s546_s8  ;;  %p552_p2 = scmp.lt.s32.totalorder %s546_s8, %s546_s8 }
   0xf   :  { %v422_v57 = vld [vmem:[%s767_s9] ss:$0 sm:$0xff] }
  0x10   :  { %517 = vmatpush3.bf16.msra.mxu1 %v516_v14  ;;  %p553_p3 = por %p552_p2, %p551_p1 }
  0x11   :  { %518 = vmatprep.subr.bf16.mxu1 %v570_v3 }
  0x12   :  { %p554_p4 = pnand %p553_p3, %p547_p0 }
  0x14   :  { %520 = vmatpush3.bf16.msra.mxu1 %v519_v17 }
  0x15   :  { %521 = vmatprep.subr.bf16.mxu1 %v570_v3 }
  0x18   :  { %523 = vmatpush3.bf16.msra.mxu1 %v522_v20 }
  0xde   :  { %v120_v22 = vpop.f32.mrb[0].mxu1 }
  0xdf   :  { %v121_v23 = vadd.f32 %v416_v21, %v120_v22  ;;  %v460_v24 = vpop.f32.mrb[1].mxu1 }
  0xe1   :  { %v124_v25 = vmax.f32 %v121_v23, 0.0 }
  0xe3   :  { %478 = vmatmul.mubr.msk.f32.vlgmr.msra.gmra.mrb[2].mxu1 %vm140_vm2, %v124_v25 }
 0x1b6   :  { %v210_v27 = vpop.f32.mrb[2].mxu1 }
 0x1b7   :  { %v211_v28 = vadd.f32 %v418_v26, %v210_v27  ;;  %v479_v29 = vpop.f32.mrb[3].mxu1 }
 0x1b9   :  { %v214_v30 = vmul.f32 0.5, %v211_v28  ;;  %397 = vst.msk [vmem:[%s769_s11] sm:$0xff] %vm50_vm1, %v211_v28 }
 0x1bb   :  { %v215_v34 = vmul.f32 1.442695, %v214_v30 }
 0x1bd   :  { %544 = vpow2.f32 %v215_v34 }
 0x1c7   :  { %v545_v35 = vpop.eup %544 }
 0x1c8   :  { %219 = vrot.lane.b32.xlu0 %v545_v35, %s573_s5 }
 0x23a   :  { %v220_v39 = vpop.permute.xlu0 %219 }
 0x23b   :  { %v222_v40 = vmul.f32 %v220_v39, %v217_v36 }
 0x23d   :  { %v223_v42 = vadd.f32 %v222_v40, %v211_v28 }
 0x23f   :  { %485 = vmatmul.mubr.msk.f32.vlgmr.msra.gmra.mrb[0].mxu0 %vm233_vm3, %v223_v42 }
 0x240   :  { %529 = vmatpush3.bf16.msra.mxu0 %v528_v41  ;;  %503 = vmatprep.mubr.msk.f32.mxu0 %vm571_vm0, %v572_v6 }
 0x241   :  { %530 = vmatprep.subr.bf16.mxu0 %v570_v3 }
 0x244   :  { %532 = vmatpush3.bf16.msra.mxu0 %v531_v45 }
 0x245   :  { %533 = vmatprep.subr.bf16.mxu0 %v570_v3 }
 0x248   :  { %535 = vmatpush3.bf16.msra.mxu0 %v534_v48 }
 0x249   :  { %536 = vmatprep.subr.bf16.mxu0 %v570_v3 }
 0x24c   :  { %538 = vmatpush3.bf16.msra.mxu0 %v537_v51 }
 0x312   :  { %v303_v53 = vpop.f32.mrb[0].mxu0 }
 0x313   :  { %v304_v54 = vadd.f32 %v420_v52, %v303_v53  ;;  %v486_v55 = vpop.f32.mrb[1].mxu0 }
 0x315   :  { %v307_v56 = vmax.f32 %v304_v54, 0.0 }
 0x317   :  { %504 = vmatmul.mubr.msk.f32.vlgmr.msra.gmra.mrb[2].mxu0 %vm140_vm2, %v307_v56 }
 0x3ea   :  { %v392_v58 = vpop.f32.mrb[2].mxu0 }
 0x3eb   :  { %v393_v59 = vadd.f32 %v422_v57, %v392_v58  ;;  %v505_v60 = vpop.f32.mrb[3].mxu0 }
 0x3ed   :  { %396 = vst.msk [vmem:[#allocation2] sm:$0xff] %vm50_vm1, %v393_v59 }
 0x3ee   :  { %557 = shalt.err (!%p554_p4)
}
 0x3ef   :  { %s558_s28 = scalar_lea.hbm %s768_s10, 128 }
 0x3f0   :  { %p559_p5 = scmp.ne.s32.totalorder %s768_s10, %s558_s28  ;;  %p562_p6 = scmp.lt.u32.totalorder %s558_s28, %s768_s10 }
 0x3f2   :  { %p564_p7 = pnand %p562_p6, %p559_p5 }
 0x3f4   :  { %567 = shalt.err (!%p564_p7)
}
 0x3f5   :  { %407 = dma.vmem_to_hbm [thread:$0]  %s405_s27, 128, %s768_s10, [#allocation3]  }
 0x3f6   :  { %568 = dma.done.wait [#allocation3], 128  }
 0x3f7   :  { %569 = vsyncadd [#allocation3], 4294967168 }
 0x3f8   :  { %415 = vsyncpa [#allocation3], 1 }

</bundles_post_ra>
